<compile_context>
chip_gen: v7x
topology: tpu7x:2x2x1
jax: 0.10.0
libtpu: 0.0.40
codegen_flags: <defaults>
</compile_context>

<pallas_src>
import functools

import jax
import jax.numpy as jnp
from jax import lax
from jax.experimental import pallas as pl
from jax.experimental.pallas import tpu as pltpu

_SLAB = 8 * 128                       # one (8,128) slab = 1024 elements
_SUB_SLABS = 8                        # slabs per unrolled inner step (bounds live vregs)
_MAX_RGB_SLABS_PER_TILE = 512         # 2 MiB f32 per rgb buffer per step
_MAX_GRAD_SLABS_PER_TILE = 128        # 1.5 MiB f32 per grad buffer per step (3 components)


def _cdiv(a, b):
    return -(-a // b)


def _as_float(x):
    x = jnp.asarray(x)
    if x.dtype not in (jnp.float32, jnp.bfloat16):
        x = x.astype(jnp.float32)
    return x


def _detect_num_tensorcores():
    """TensorCores per chip: v4/v5p/v7x have 2, v5e/v6e have 1 (safe fallback: 1)."""
    try:
        info = pltpu.get_tpu_info()
        for name in ("num_cores", "core_count", "num_tensorcores", "tensor_core_count"):
            v = getattr(info, name, None)
            if v:
                return max(1, min(int(v), 2))
    except Exception:
        pass
    try:
        kind = jax.devices()[0].device_kind.lower()
        if any(tag in kind for tag in ("v4", "v5p", "v7")):
            return 2
    except Exception:
        pass
    return 1


def _loss_sums_kernel(*refs, has_grad, s_rgb, tr8, rgb_ragged, s_grad, gc, m_grad, grad_masked):
    """grid = (chunks [parallel], tiles-per-chunk [arbitrary]).

    Per chunk: accumulate per-lane (8,128) partial sums in VMEM scratch (leading-axis, VPU-only
    reductions over lane-dense slabs), then at the last inner step do the one-time cross-lane/
    sublane reduce and write (1,1) SMEM scalars:
      rgb_sum[c] = sum |rgb - gt|        eik_sum[c] = sum (||grad||_2 - 1)^2
    """
    if has_grad:
        (rgb_ref, gt_ref, grad_ref,
         rgb_sum_ref, eik_sum_ref,
         rgb_acc_ref, eik_acc_ref) = refs
    else:
        rgb_ref, gt_ref, rgb_sum_ref, rgb_acc_ref = refs

    c = pl.program_id(0)
    t = pl.program_id(1)
    n_inner = pl.num_programs(1)
    blk = c * n_inner + t                     # global (unclamped) block index

    @pl.when(t == 0)
    def _init():
        rgb_acc_ref[...] = jnp.zeros_like(rgb_acc_ref)
        if has_grad:
            eik_acc_ref[...] = jnp.zeros_like(eik_acc_ref)

    # ---------- RGB: per-lane L1 partial sums over lane-dense slabs ----------
    if rgb_ragged:
        rgb_valid = s_rgb - blk * tr8         # valid slabs in this block (may be <= 0)
    acc = jnp.zeros((8, 128), jnp.float32)
    for s0 in range(0, tr8, _SUB_SLABS):
        n = min(_SUB_SLABS, tr8 - s0)
        a = rgb_ref[s0:s0 + n].astype(jnp.float32)
        b = gt_ref[s0:s0 + n].astype(jnp.float32)
        d = jnp.abs(a - b)                    # (n, 8, 128)
        if rgb_ragged:
            sid = s0 + lax.broadcasted_iota(jnp.int32, (n, 8, 128), 0)
            d = jnp.where(sid < rgb_valid, d, 0.0)
        acc = acc + jnp.sum(d, axis=0)        # leading-axis reduce -> pure VPU adds
    rgb_acc_ref[...] += acc

    # ---------- Eikonal: per-lane (||g|| - 1)^2 partial sums ----------
    if has_grad:
        ncomp = grad_ref.shape[0]
        if grad_masked:
            intra = (lax.broadcasted_iota(jnp.int32, (8, 128), 0) * 128
                     + lax.broadcasted_iota(jnp.int32, (8, 128), 1))
        eacc = jnp.zeros((8, 128), jnp.float32)
        for s0 in range(0, gc, _SUB_SLABS):
            n = min(_SUB_SLABS, gc - s0)
            sq = jnp.zeros((n, 8, 128), jnp.float32)
            for comp in range(ncomp):
                g = grad_ref[comp, s0:s0 + n].astype(jnp.float32)
                sq = sq + g * g
            e = (jnp.sqrt(sq) - 1.0) ** 2     # sqrt -> EUP slot
            if grad_masked:
                # exact element mask: column index < m_grad (covers padded and OOB columns)
                col = ((blk * gc + s0) * _SLAB
                       + lax.broadcasted_iota(jnp.int32, (n, 8, 128), 0) * _SLAB
                       + intra)
                e = jnp.where(col < m_grad, e, 0.0)
            eacc = eacc + jnp.sum(e, axis=0)
        eik_acc_ref[...] += eacc

    # ---------- one-time cross-lane/sublane reduce per chunk -> SMEM scalars ----------
    @pl.when(t == n_inner - 1)
    def _finalize():
        rgb_sum_ref[0, 0] = jnp.sum(rgb_acc_ref[...])
        if has_grad:
            eik_sum_ref[0, 0] = jnp.sum(eik_acc_ref[...])


def volsdf_loss(rgb_values, rgb_gt, grad_theta=None, *,
                eikonal_weight=0.1,
                num_parallel_chunks=None,
                max_rgb_slabs_per_tile=_MAX_RGB_SLABS_PER_TILE,
                max_grad_slabs_per_tile=_MAX_GRAD_SLABS_PER_TILE):
    """Pallas implementation of VolSDFLoss.forward. Returns dict of scalar losses."""
    rgb_values = _as_float(rgb_values)
    rgb_gt = _as_float(rgb_gt)
    n_rgb = int(rgb_values.size)
    if n_rgb == 0:
        raise ValueError("rgb_values must be non-empty")
    if int(rgb_gt.size) != n_rgb:
        raise ValueError("rgb_gt and rgb_values must have the same number of elements")

    has_grad = grad_theta is not None
    if has_grad:
        grad = _as_float(grad_theta)
        grad2d = grad.reshape(-1, grad.shape[-1])
        m_grad = int(grad2d.shape[0])
        if m_grad == 0:
            # Guard (review): torch's mean over an empty tensor would be NaN; define it as 0.
            has_grad = False

    # --- rgb / gt: flatten -> lane-dense (slabs, 8, 128). Copy-free bitcast reshape when the
    #     element count is a slab multiple; otherwise only the <1024-element tail is padded
    #     (|0 - 0| == 0 so zero padding is exact). ---
    s_rgb = _cdiv(n_rgb, _SLAB)
    rgb_flat = rgb_values.reshape(-1)
    gt_flat = rgb_gt.reshape(-1)
    tail = s_rgb * _SLAB - n_rgb
    if tail:
        rgb_flat = jnp.pad(rgb_flat, (0, tail))
        gt_flat = jnp.pad(gt_flat, (0, tail))
    rgb3d = rgb_flat.reshape(s_rgb, 8, 128)
    gt3d = gt_flat.reshape(s_rgb, 8, 128)

    # --- grad: zero-pad rows to a slab multiple folded into the (unavoidable) transpose pass;
    #     padded columns are masked exactly inside the kernel (no unit-column concat). ---
    if has_grad:
        s_grad = _cdiv(m_grad, _SLAB)
        col_pad = s_grad * _SLAB - m_grad
        gT = (jnp.pad(grad2d, ((0, col_pad), (0, 0))) if col_pad else grad2d).T
        ncomp = int(grad2d.shape[1])
        grad4d = gT.reshape(ncomp, s_grad, 8, 128)
    else:
        s_grad, col_pad, ncomp = 0, 0, 0

    # --- grid: (chunks [parallel], tiles-per-chunk [arbitrary]) ---
    t_needed = max(_cdiv(s_rgb, max_rgb_slabs_per_tile),
                   _cdiv(s_grad, max_grad_slabs_per_tile) if has_grad else 0, 1)
    nc = _detect_num_tensorcores() if num_parallel_chunks is None else int(num_parallel_chunks)
    nc = max(1, min(nc, max(t_needed // 2, 1)))   # keep >= 2 tiles of work per chunk
    t_inner = _cdiv(t_needed, nc)
    t_total = nc * t_inner

    tr8 = _cdiv(s_rgb, t_total)                   # rgb slabs per grid step
    n_rgb_blocks = _cdiv(s_rgb, tr8)
    rgb_ragged = (t_total * tr8) != s_rgb
    last_rgb_blk = n_rgb_blocks - 1

    def rgb_map(c, t):
        return (jnp.minimum(c * t_inner + t, last_rgb_blk), 0, 0)

    in_specs = [pl.BlockSpec((tr8, 8, 128), rgb_map),
                pl.BlockSpec((tr8, 8, 128), rgb_map)]
    inputs = [rgb3d, gt3d]

    sum_shape = jax.ShapeDtypeStruct((nc, 1), jnp.float32)
    sum_spec = pl.BlockSpec((1, 1), lambda c, t: (c, 0),
                            memory_space=pltpu.MemorySpace.SMEM)
    out_shapes = [sum_shape]
    out_specs = [sum_spec]
    scratch = [pltpu.VMEM((8, 128), jnp.float32)]

    if has_grad:
        gc = _cdiv(s_grad, t_total)
        n_grad_blocks = _cdiv(s_grad, gc)
        grad_masked = (col_pad > 0) or ((t_total * gc) != s_grad)
        last_grad_blk = n_grad_blocks - 1

        def grad_map(c, t):
            return (0, jnp.minimum(c * t_inner + t, last_grad_blk), 0, 0)

        in_specs.append(pl.BlockSpec((ncomp, gc, 8, 128), grad_map))
        inputs.append(grad4d)
        out_shapes.append(sum_shape)
        out_specs.append(sum_spec)
        scratch.append(pltpu.VMEM((8, 128), jnp.float32))
    else:
        gc, grad_masked, m_grad = 0, False, 0

    flops = 3 * s_rgb * _SLAB
    transc = 0
    bytes_accessed = (rgb3d.size * rgb3d.dtype.itemsize
                      + gt3d.size * gt3d.dtype.itemsize)
    if has_grad:
        flops += (3 * ncomp + 3) * s_grad * _SLAB
        transc = s_grad * _SLAB
        bytes_accessed += grad4d.size * grad4d.dtype.itemsize
    cost = pl.CostEstimate(flops=int(flops), transcendentals=int(transc),
                           bytes_accessed=int(bytes_accessed))

    kernel = functools.partial(
        _loss_sums_kernel, has_grad=has_grad,
        s_rgb=s_rgb, tr8=tr8, rgb_ragged=rgb_ragged,
        s_grad=s_grad, gc=gc, m_grad=m_grad, grad_masked=grad_masked)

    outs = pl.pallas_call(
        kernel,
        grid=(nc, t_inner),
        in_specs=in_specs,
        out_specs=tuple(out_specs),
        out_shape=tuple(out_shapes),
        scratch_shapes=tuple(scratch),
        compiler_params=pltpu.CompilerParams(
            dimension_semantics=("parallel", "arbitrary"),
            vmem_limit_bytes=32 * 1024 * 1024),
        cost_estimate=cost,
    )(*inputs)

    if has_grad:
        rgb_sums, eik_sums = outs
        eikonal_loss = jnp.sum(eik_sums) / jnp.float32(m_grad)
    else:
        (rgb_sums,) = outs
        eikonal_loss = jnp.float32(0.0)
    rgb_loss = jnp.sum(rgb_sums) / jnp.float32(n_rgb)
    loss = rgb_loss + jnp.float32(eikonal_weight) * eikonal_loss
    return {"loss": loss, "rgb_loss": rgb_loss, "eikonal_loss": eikonal_loss}


def _reference(rgb_values, rgb_gt, grad_theta, eikonal_weight):
    a = jnp.asarray(rgb_values).reshape(-1).astype(jnp.float32)
    b = jnp.asarray(rgb_gt).reshape(-1).astype(jnp.float32)
    rgb_loss = jnp.mean(jnp.abs(a - b))
    if grad_theta is None:
        eik = jnp.float32(0.0)
    else:
        g = jnp.asarray(grad_theta).astype(jnp.float32)
        eik = jnp.mean((jnp.linalg.norm(g, axis=-1) - 1.0) ** 2)
    return rgb_loss + eikonal_weight * eik, rgb_loss, eik


if __name__ == "__main__":
    key = jax.random.PRNGKey(0)
    k1, k2, k3, k4, k5, k6 = jax.random.split(key, 6)

    loss_fn = jax.jit(volsdf_loss, static_argnames=(
        "eikonal_weight", "num_parallel_chunks",
        "max_rgb_slabs_per_tile", "max_grad_slabs_per_tile"))
    w = 0.1

    # Case 1: typical small VolSDF step (batch=2 images, 64 rays each; 128 eikonal points).
    N, M = 128, 128
    rgb_values = jax.random.uniform(k1, (N, 3), jnp.float32)      # model_outputs['rgb_values']
    rgb_gt = jax.random.uniform(k2, (2, N // 2, 3), jnp.float32)  # ground_truth['rgb']
    grad_theta = jax.random.normal(k3, (M, 3), jnp.float32)       # model_outputs['grad_theta']

    out = jax.block_until_ready(loss_fn(rgb_values, rgb_gt, grad_theta, eikonal_weight=w))
    ref_loss, ref_rgb, ref_eik = _reference(rgb_values, rgb_gt, grad_theta, w)
    assert jnp.allclose(out["rgb_loss"], ref_rgb, rtol=3e-5, atol=1e-6)
    assert jnp.allclose(out["eikonal_loss"], ref_eik, rtol=3e-5, atol=1e-6)
    assert jnp.allclose(out["loss"], ref_loss, rtol=3e-5, atol=1e-6)

    # Case 2: grad_theta absent -> eikonal term exactly zero (trace-time branch, no dummy input).
    out_ng = jax.block_until_ready(loss_fn(rgb_values, rgb_gt, None, eikonal_weight=w))
    assert jnp.allclose(out_ng["eikonal_loss"], 0.0)
    assert jnp.allclose(out_ng["rgb_loss"], ref_rgb, rtol=3e-5, atol=1e-6)
    assert jnp.allclose(out_ng["loss"], ref_rgb, rtol=3e-5, atol=1e-6)

    # Case 3: bf16 inputs taken natively; small tile caps + 2 chunks to exercise the multi-tile,
    # clamped-index and ragged-mask paths on a still-small problem.
    N2, M2 = 3000, 2500
    rgb2 = jax.random.uniform(k4, (N2, 3), jnp.float32).astype(jnp.bfloat16)
    gt2 = jax.random.uniform(k5, (N2, 3), jnp.float32).astype(jnp.bfloat16)
    grad2 = jax.random.normal(k6, (M2, 3), jnp.float32).astype(jnp.bfloat16)
    out2 = jax.block_until_ready(loss_fn(
        rgb2, gt2, grad2, eikonal_weight=w, num_parallel_chunks=2,
        max_rgb_slabs_per_tile=2, max_grad_slabs_per_tile=1))
    ref2_loss, ref2_rgb, ref2_eik = _reference(rgb2, gt2, grad2, w)
    assert jnp.allclose(out2["rgb_loss"], ref2_rgb, rtol=1e-4, atol=1e-5)
    assert jnp.allclose(out2["eikonal_loss"], ref2_eik, rtol=1e-4, atol=1e-5)
    assert jnp.allclose(out2["loss"], ref2_loss, rtol=1e-4, atol=1e-5)

    print("KERNEL_OK")
</pallas_src>

<mosaic_0001>
module attributes {stable_mosaic.version = 11 : i64} {
  func.func @_loss_sums_kernel(%arg0: i32, %arg1: i32, %arg2: memref<1x8x128xf32, #tpu.memory_space<vmem>>, %arg3: memref<1x8x128xf32, #tpu.memory_space<vmem>>, %arg4: memref<3x1x8x128xf32, #tpu.memory_space<vmem>>, %arg5: memref<1x1xf32, #tpu.memory_space<smem>>, %arg6: memref<1x1xf32, #tpu.memory_space<smem>>, %arg7: memref<8x128xf32, #tpu.memory_space<vmem>>, %arg8: memref<8x128xf32, #tpu.memory_space<vmem>>) attributes {dimension_semantics = [#tpu.dimension_semantics<parallel>, #tpu.dimension_semantics<arbitrary>], iteration_bounds = array<i64: 1, 1>, scalar_prefetch = 0 : i64, scratch_operands = 2 : i64, tpu.core_type = #tpu.core_type<tc>, window_params = [{transform_indices = @transform_0, window_bounds = array<i64: 1, 8, 128>}, {transform_indices = @transform_1, window_bounds = array<i64: 1, 8, 128>}, {transform_indices = @transform_2, window_bounds = array<i64: 3, 1, 8, 128>}, {transform_indices = @transform_3, window_bounds = array<i64: 1, 1>}, {transform_indices = @transform_4, window_bounds = array<i64: 1, 1>}]} {
    %c1_i32 = arith.constant 1 : i32
    %0 = arith.muli %arg0, %c1_i32 : i32
    %1 = arith.addi %0, %arg1 : i32
    %c0_i32 = arith.constant 0 : i32
    %2 = arith.cmpi eq, %arg1, %c0_i32 : i32
    %3 = arith.extui %2 : i1 to i32
    %c0_i32_0 = arith.constant 0 : i32
    %4 = arith.cmpi ne, %3, %c0_i32_0 : i32
    scf.if %4 {
      %cst_36 = arith.constant 0.000000e+00 : f32
      %60 = vector.broadcast %cst_36 : f32 to vector<8x128xf32>
      %c0_37 = arith.constant 0 : index
      %c0_38 = arith.constant 0 : index
      %61 = vector.load %arg7[%c0_37, %c0_38] : memref<8x128xf32, #tpu.memory_space<vmem>>, vector<8x128xf32>
      tpu.vector_store %arg7[%c0_37, %c0_38], %60 {strides = array<i32>} : memref<8x128xf32, #tpu.memory_space<vmem>>, vector<8x128xf32>,
      %cst_39 = arith.constant 0.000000e+00 : f32
      %62 = vector.broadcast %cst_39 : f32 to vector<8x128xf32>
      %c0_40 = arith.constant 0 : index
      %c0_41 = arith.constant 0 : index
      %63 = vector.load %arg8[%c0_40, %c0_41] : memref<8x128xf32, #tpu.memory_space<vmem>>, vector<8x128xf32>
      tpu.vector_store %arg8[%c0_40, %c0_41], %62 {strides = array<i32>} : memref<8x128xf32, #tpu.memory_space<vmem>>, vector<8x128xf32>,
    } else {
    }
    %cst = arith.constant 0.000000e+00 : f32
    %5 = vector.broadcast %cst : f32 to vector<8x128xf32>
    %c0 = arith.constant 0 : index
    %c0_1 = arith.constant 0 : index
    %c0_2 = arith.constant 0 : index
    %6 = vector.load %arg2[%c0, %c0_1, %c0_2] : memref<1x8x128xf32, #tpu.memory_space<vmem>>, vector<1x8x128xf32>
    %c0_3 = arith.constant 0 : index
    %c0_4 = arith.constant 0 : index
    %c0_5 = arith.constant 0 : index
    %7 = vector.load %arg3[%c0_3, %c0_4, %c0_5] : memref<1x8x128xf32, #tpu.memory_space<vmem>>, vector<1x8x128xf32>
    %8 = arith.subf %6, %7 : vector<1x8x128xf32>
    %9 = math.absf %8 : vector<1x8x128xf32>
    %cst_6 = arith.constant dense<0.000000e+00> : vector<8x128xf32>
    %10 = vector.multi_reduction <add>, %9, %cst_6 [0] : vector<1x8x128xf32> to vector<8x128xf32>
    %11 = arith.addf %5, %10 : vector<8x128xf32>
    %c0_7 = arith.constant 0 : index
    %c0_8 = arith.constant 0 : index
    %12 = vector.load %arg7[%c0_7, %c0_8] : memref<8x128xf32, #tpu.memory_space<vmem>>, vector<8x128xf32>
    %13 = arith.addf %12, %11 : vector<8x128xf32>
    %c0_9 = arith.constant 0 : index
    %c0_10 = arith.constant 0 : index
    %14 = vector.load %arg7[%c0_9, %c0_10] : memref<8x128xf32, #tpu.memory_space<vmem>>, vector<8x128xf32>
    tpu.vector_store %arg7[%c0_9, %c0_10], %13 {strides = array<i32>} : memref<8x128xf32, #tpu.memory_space<vmem>>, vector<8x128xf32>,
    %15 = tpu.iota {dimensions = array<i32: 0>} : vector<8x128xi32>
    %c128_i32 = arith.constant 128 : i32
    %16 = vector.broadcast %c128_i32 : i32 to vector<8x128xi32>
    %17 = arith.muli %15, %16 : vector<8x128xi32>
    %18 = tpu.iota {dimensions = array<i32: 1>} : vector<8x128xi32>
    %19 = arith.addi %17, %18 : vector<8x128xi32>
    %cst_11 = arith.constant 0.000000e+00 : f32
    %20 = vector.broadcast %cst_11 : f32 to vector<8x128xf32>
    %cst_12 = arith.constant 0.000000e+00 : f32
    %21 = vector.broadcast %cst_12 : f32 to vector<1x8x128xf32>
    %c0_13 = arith.constant 0 : index
    %c0_14 = arith.constant 0 : index
    %c0_15 = arith.constant 0 : index
    %c0_16 = arith.constant 0 : index
    %22 = vector.load %arg4[%c0_13, %c0_14, %c0_15, %c0_16] : memref<3x1x8x128xf32, #tpu.memory_space<vmem>>, vector<1x1x8x128xf32>
    %23 = vector.shape_cast %22 : vector<1x1x8x128xf32> to vector<1x8x128xf32>
    %24 = arith.mulf %23, %23 : vector<1x8x128xf32>
    %25 = arith.addf %21, %24 : vector<1x8x128xf32>
    %c1 = arith.constant 1 : index
    %c0_17 = arith.constant 0 : index
    %c0_18 = arith.constant 0 : index
    %c0_19 = arith.constant 0 : index
    %26 = vector.load %arg4[%c1, %c0_17, %c0_18, %c0_19] : memref<3x1x8x128xf32, #tpu.memory_space<vmem>>, vector<1x1x8x128xf32>
    %27 = vector.shape_cast %26 : vector<1x1x8x128xf32> to vector<1x8x128xf32>
    %28 = arith.mulf %27, %27 : vector<1x8x128xf32>
    %29 = arith.addf %25, %28 : vector<1x8x128xf32>
    %c2 = arith.constant 2 : index
    %c0_20 = arith.constant 0 : index
    %c0_21 = arith.constant 0 : index
    %c0_22 = arith.constant 0 : index
    %30 = vector.load %arg4[%c2, %c0_20, %c0_21, %c0_22] : memref<3x1x8x128xf32, #tpu.memory_space<vmem>>, vector<1x1x8x128xf32>
    %31 = vector.shape_cast %30 : vector<1x1x8x128xf32> to vector<1x8x128xf32>
    %32 = arith.mulf %31, %31 : vector<1x8x128xf32>
    %33 = arith.addf %29, %32 : vector<1x8x128xf32>
    %34 = math.sqrt %33 : vector<1x8x128xf32>
    %cst_23 = arith.constant 1.000000e+00 : f32
    %35 = vector.broadcast %cst_23 : f32 to vector<1x8x128xf32>
    %36 = arith.subf %34, %35 : vector<1x8x128xf32>
    %37 = arith.mulf %36, %36 : vector<1x8x128xf32>
    %c1_i32_24 = arith.constant 1 : i32
    %38 = arith.muli %1, %c1_i32_24 : i32
    %c0_i32_25 = arith.constant 0 : i32
    %39 = arith.addi %38, %c0_i32_25 : i32
    %c1024_i32 = arith.constant 1024 : i32
    %40 = arith.muli %39, %c1024_i32 : i32
    %41 = tpu.iota {dimensions = array<i32: 0>} : vector<1x8x128xi32>
    %c1024_i32_26 = arith.constant 1024 : i32
    %42 = vector.broadcast %c1024_i32_26 : i32 to vector<1x8x128xi32>
    %43 = arith.muli %41, %42 : vector<1x8x128xi32>
    %44 = vector.broadcast %40 : i32 to vector<1x8x128xi32>
    %45 = arith.addi %44, %43 : vector<1x8x128xi32>
    %46 = vector.shape_cast %19 : vector<8x128xi32> to vector<1x8x128xi32>
    %47 = arith.addi %45, %46 : vector<1x8x128xi32>
    %c128_i32_27 = arith.constant 128 : i32
    %48 = vector.broadcast %c128_i32_27 : i32 to vector<1x8x128xi32>
    %49 = arith.cmpi slt, %47, %48 : vector<1x8x128xi32>
    %cst_28 = arith.constant 0.000000e+00 : f32
    %50 = vector.broadcast %cst_28 : f32 to vector<1x8x128xf32>
    %51 = arith.select %49, %37, %50 : vector<1x8x128xi1>, vector<1x8x128xf32>
    %cst_29 = arith.constant dense<0.000000e+00> : vector<8x128xf32>
    %52 = vector.multi_reduction <add>, %51, %cst_29 [0] : vector<1x8x128xf32> to vector<8x128xf32>
    %53 = arith.addf %20, %52 : vector<8x128xf32>
    %c0_30 = arith.constant 0 : index
    %c0_31 = arith.constant 0 : index
    %54 = vector.load %arg8[%c0_30, %c0_31] : memref<8x128xf32, #tpu.memory_space<vmem>>, vector<8x128xf32>
    %55 = arith.addf %54, %53 : vector<8x128xf32>
    %c0_32 = arith.constant 0 : index
    %c0_33 = arith.constant 0 : index
    %56 = vector.load %arg8[%c0_32, %c0_33] : memref<8x128xf32, #tpu.memory_space<vmem>>, vector<8x128xf32>
    tpu.vector_store %arg8[%c0_32, %c0_33], %55 {strides = array<i32>} : memref<8x128xf32, #tpu.memory_space<vmem>>, vector<8x128xf32>,
    %c0_i32_34 = arith.constant 0 : i32
    %57 = arith.cmpi eq, %arg1, %c0_i32_34 : i32
    %58 = arith.extui %57 : i1 to i32
    %c0_i32_35 = arith.constant 0 : i32
    %59 = arith.cmpi ne, %58, %c0_i32_35 : i32
    scf.if %59 {
      %c0_36 = arith.constant 0 : index
      %c0_37 = arith.constant 0 : index
      %60 = vector.load %arg7[%c0_36, %c0_37] : memref<8x128xf32, #tpu.memory_space<vmem>>, vector<8x128xf32>
      %61 = vector.shape_cast %60 : vector<8x128xf32> to vector<1x8x128xf32>
      %cst_38 = arith.constant dense<0.000000e+00> : vector<1xf32>
      %62 = vector.multi_reduction <add>, %61, %cst_38 [1, 2] : vector<1x8x128xf32> to vector<1xf32>
      %63 = vector.shape_cast %62 : vector<1xf32> to vector<1x1x1xf32>
      %64 = vector.extract %63[0, 0, 0] : f32 from vector<1x1x1xf32>
      %c0_39 = arith.constant 0 : index
      %c0_40 = arith.constant 0 : index
      %65 = memref.load %arg5[%c0_39, %c0_40] : memref<1x1xf32, #tpu.memory_space<smem>>
      memref.store %64, %arg5[%c0_39, %c0_40] : memref<1x1xf32, #tpu.memory_space<smem>>
      %c0_41 = arith.constant 0 : index
      %c0_42 = arith.constant 0 : index
      %66 = vector.load %arg8[%c0_41, %c0_42] : memref<8x128xf32, #tpu.memory_space<vmem>>, vector<8x128xf32>
      %67 = vector.shape_cast %66 : vector<8x128xf32> to vector<1x8x128xf32>
      %cst_43 = arith.constant dense<0.000000e+00> : vector<1xf32>
      %68 = vector.multi_reduction <add>, %67, %cst_43 [1, 2] : vector<1x8x128xf32> to vector<1xf32>
      %69 = vector.shape_cast %68 : vector<1xf32> to vector<1x1x1xf32>
      %70 = vector.extract %69[0, 0, 0] : f32 from vector<1x1x1xf32>
      %c0_44 = arith.constant 0 : index
      %c0_45 = arith.constant 0 : index
      %71 = memref.load %arg6[%c0_44, %c0_45] : memref<1x1xf32, #tpu.memory_space<smem>>
      memref.store %70, %arg6[%c0_44, %c0_45] : memref<1x1xf32, #tpu.memory_space<smem>>
    } else {
    }
    return
  }
  func.func @transform_0(%arg0: i32, %arg1: i32) -> (i32, i32, i32) {
    %c1_i32 = arith.constant 1 : i32
    %0 = arith.muli %arg0, %c1_i32 : i32
    %1 = arith.addi %0, %arg1 : i32
    %c0_i32 = arith.constant 0 : i32
    %2 = arith.minsi %1, %c0_i32 : i32
    %c0_i32_0 = arith.constant 0 : i32
    %c0_i32_1 = arith.constant 0 : i32
    %c0_i32_2 = arith.constant 0 : i32
    return %2, %c0_i32_0, %c0_i32_1 : i32, i32, i32
  }
  func.func @transform_1(%arg0: i32, %arg1: i32) -> (i32, i32, i32) {
    %c1_i32 = arith.constant 1 : i32
    %0 = arith.muli %arg0, %c1_i32 : i32
    %1 = arith.addi %0, %arg1 : i32
    %c0_i32 = arith.constant 0 : i32
    %2 = arith.minsi %1, %c0_i32 : i32
    %c0_i32_0 = arith.constant 0 : i32
    %c0_i32_1 = arith.constant 0 : i32
    %c0_i32_2 = arith.constant 0 : i32
    return %2, %c0_i32_0, %c0_i32_1 : i32, i32, i32
  }
  func.func @transform_2(%arg0: i32, %arg1: i32) -> (i32, i32, i32, i32) {
    %c1_i32 = arith.constant 1 : i32
    %0 = arith.muli %arg0, %c1_i32 : i32
    %1 = arith.addi %0, %arg1 : i32
    %c0_i32 = arith.constant 0 : i32
    %2 = arith.minsi %1, %c0_i32 : i32
    %c0_i32_0 = arith.constant 0 : i32
    %c0_i32_1 = arith.constant 0 : i32
    %c0_i32_2 = arith.constant 0 : i32
    %c0_i32_3 = arith.constant 0 : i32
    return %c0_i32_0, %2, %c0_i32_1, %c0_i32_2 : i32, i32, i32, i32
  }
  func.func @transform_3(%arg0: i32, %arg1: i32) -> (i32, i32) {
    %c0_i32 = arith.constant 0 : i32
    %c0_i32_0 = arith.constant 0 : i32
    return %arg0, %c0_i32 : i32, i32
  }
  func.func @transform_4(%arg0: i32, %arg1: i32) -> (i32, i32) {
    %c0_i32 = arith.constant 0 : i32
    %c0_i32_0 = arith.constant 0 : i32
    return %arg0, %c0_i32 : i32, i32
  }
}

</mosaic_0001>

<bundles_post_ra>
// kernel: volsdf_loss.1
= control target key start
LH: loop header
LB: loop body
LE: loop exit
PB: predicated region body
PF: predicated region fallthrough
CT: control target
= control target key end

     0   :  { %10 = vsyncpa [#allocation5], 0  ;;  %s322_s0 = inlined_call_operand.vmem [shape: f32[1,8,128], index: 0, kind: input, shape index: {}]   ;;  %s323_s1 = inlined_call_operand.vmem [shape: f32[1,8,128], index: 1, kind: input, shape index: {}]   ;;  %s324_s2 = inlined_call_operand.vmem [shape: f32[3,1,8,128], index: 2, kind: input, shape index: {}]   ;;  %s325_s3 = inlined_call_operand.hbm [shape: f32[1,1], index: 3, kind: output, shape index: {0}]   ;;  %s326_s4 = inlined_call_operand.hbm [shape: f32[1,1], index: 4, kind: output, shape index: {1}]  }
   0x1   :  { %v106_v0 = vld [vmem:[%s322_s0] sm:$0xff]  ;;  %v221_v5 = vld [vmem:[%s324_s2 + $0x8] sm:$0xff]  ;;  %v222_v6 = vld [vmem:[%s324_s2 + $0x10] sm:$0xff] }
   0x2   :  { %v107_v1 = vld [vmem:[%s323_s1] sm:$0xff] }
   0x3   :  { %v121_v2 = vld [vmem:[%s324_s2] sm:$0xff]  ;;  %v108_v3 = vsub.f32 %v106_v0, %v107_v1 }
   0x4   :  { %v122_v4 = vmul.f32 %v121_v2, %v121_v2 }
   0x5   :  { %11 = vsyncpa [#allocation7], 0  ;;  %v126_v7 = vmul.f32 %v221_v5, %v221_v5  ;;  %v130_v8 = vmul.f32 %v222_v6, %v222_v6  ;;  %v109_v9 = vand.u32 2147483647, %v108_v3  ;;  %v115_v12 = vlaneseq  ;;  %s232_s25 = scalar_lea.hbm %s325_s3, 16 }
   0x6   :  { %p233_p0 = scmp.ne.s32.totalorder %s325_s3, %s232_s25  ;;  %p236_p1 = scmp.lt.u32.totalorder %s232_s25, %s325_s3 }
   0x7   :  { %v127_v10 = vadd.f32 %v126_v7, %v122_v4  ;;  %155 = vadd.xlane.f32.xlu0 %v109_v9  ;;  %v116_v13 = vshrl.u32 %v115_v12, 7  ;;  %v119_v15 = vand.u32 127, %v115_v12 }
   0x8   :  { %p238_p2 = pnand %p236_p1, %p233_p0 }
   0x9   :  { %v131_v11 = vadd.f32 %v130_v8, %v127_v10  ;;  %v117_v14 = vmul.u32 128, %v116_v13 }
   0xb   :  { %230 = vrsqrt.f32 %v131_v11  ;;  %vm134_vm0 = vcmp.eq.f32.partialorder %v131_v11, inf  ;;  %v137_v17 = vand.u32 2147483648, %v131_v11  ;;  %vm136_vm1 = vcmp.eq.f32.partialorder %v131_v11, 0.0 }
   0xc   :  { %v120_v19 = vadd.s32 %v119_v15, %v117_v14 }
   0xe   :  { %vm144_vm2 = vcmp.lt.s32.totalorder %v120_v19, 128 }
  0x15   :  { %v231_v16 = vpop.eup %230 }
  0x16   :  { %v133_v18 = vmul.f32 %v231_v16, %v131_v11 }
  0x18   :  { %v135_v20 = vsel %vm134_vm0, %v131_v11, %v133_v18 }
  0x19   :  { %v138_v21 = vsel %vm136_vm1, %v137_v17, %v135_v20 }
  0x1a   :  { %v223_v22 = vadd.f32 -1.0, %v138_v21 }
  0x1c   :  { %v140_v23 = vmul.f32 %v223_v22, %v223_v22 }
  0x1e   :  { %v145_v24 = vsel %vm144_vm2, %v140_v23, 0.0 }
  0x1f   :  { %167 = vadd.xlane.f32.xlu0 %v145_v24 }
  0x94   :  { %v156_v25 = vpop.xlane.xlu0 %155 }
  0x95   :  { %v157_v26 = vrot.slane %v156_v25, 4 }
  0x97   :  { %v158_v27 = vadd.f32 %v157_v26, %v156_v25 }
  0x99   :  { %v159_v28 = vrot.slane %v158_v27, 2 }
  0x9b   :  { %v160_v29 = vadd.f32 %v159_v28, %v158_v27 }
  0x9d   :  { %v161_v30 = vrot.slane %v160_v29, 1 }
  0x9f   :  { %v162_v31 = vadd.f32 %v161_v30, %v160_v29 }
  0xa1   :  { %224 = vpush %v162_v31 }
  0xac   :  { %v168_v32 = vpop.xlane.xlu0 %167 }
  0xad   :  { %v169_v33 = vrot.slane %v168_v32, 4 }
  0xaf   :  { %v170_v34 = vadd.f32 %v169_v33, %v168_v32 }
  0xb1   :  { %v171_v35 = vrot.slane %v170_v34, 2 }
  0xb3   :  { %v172_v36 = vadd.f32 %v171_v35, %v170_v34 }
  0xb5   :  { %v173_v37 = vrot.slane %v172_v36, 1 }
  0xb7   :  { %v174_v38 = vadd.f32 %v173_v37, %v172_v36 }
  0xb9   :  { %226 = vpush %v174_v38 }
  0xd2   :  { %s225_s0 = spop %224 }
  0xd3   :  { %165 = sst [smem:[#allocation4]] %s225_s0 }
  0xd4   :  { %241 = shalt.err (!%p238_p2)
}
  0xd5   :  { %s256_s30 = smov [#allocation4]   ;;  %s242_s10 = scalar_lea.hbm %s326_s4, 16 }
  0xd6   :  { %185 = dma.smem_to_hbm %s256_s30, 16, %s325_s3, [#allocation5]  }
  0xd7   :  { %p243_p3 = scmp.ne.s32.totalorder %s326_s4, %s242_s10  ;;  %p246_p4 = scmp.lt.u32.totalorder %s242_s10, %s326_s4 }
  0xd9   :  { %p248_p5 = pnand %p246_p4, %p243_p3 }
  0xea   :  { %s227_s7 = spop %226 }
  0xeb   :  { %177 = sst [smem:[#allocation6]] %s227_s7 }
  0xec   :  { %251 = shalt.err (!%p248_p5)
}
  0xed   :  { %s257_s15 = smov [#allocation6]  }
  0xee   :  { %193 = dma.smem_to_hbm %s257_s15, 16, %s326_s4, [#allocation7]  }
  0xef   :  { %252 = dma.done.wait [#allocation5], 16  }
  0xf0   :  { %253 = vsyncadd [#allocation5], 4294967280 }
  0xf1   :  { %254 = dma.done.wait [#allocation7], 16  }
  0xf2   :  { %255 = vsyncadd [#allocation7], 4294967280 }
  0xf3   :  { %200 = sfence }
  0xf4   :  { %201 = vsyncpa [#allocation5], 1 }
  0xf5   :  { %202 = vsyncpa [#allocation7], 1 }

</bundles_post_ra>
